<compile_context>
chip_gen: v7x
topology: tpu7x:2x2x1
jax: 0.10.0
libtpu: 0.0.40
codegen_flags: <defaults>
</compile_context>

<pallas_src>
import math
from functools import partial

import jax
import jax.numpy as jnp
from jax import lax
from jax.experimental import pallas as pl
from jax.experimental.pallas import tpu as pltpu


def _ds_attention_kernel(q_ref, k_ref, v_ref, tau_ref, delta_ref,
                         v_out_ref, a_out_ref, *, scale):
    # q_ref    : (1, 1, L, E)   queries for this (batch, head)
    # k_ref    : (1, 1, S, E)   keys
    # v_ref    : (1, 1, S, D)   values
    # tau_ref  : (1, 1, 1)      per-batch de-stationary scale
    # delta_ref: (1, 1, S)      per-batch de-stationary shift
    # v_out_ref: (1, 1, L, D)
    # a_out_ref: (1, 1, L, S)
    q = q_ref[0, 0]            # (L, E)
    k = k_ref[0, 0]            # (S, E)
    v = v_ref[0, 0]            # (S, D)
    tau = tau_ref[0, 0, 0]     # scalar
    delta = delta_ref[0]       # (1, S)

    # scores = Q @ K^T  (contract over E; no explicit transpose needed)
    scores = lax.dot_general(
        q, k, dimension_numbers=(((1,), (1,)), ((), ())),
        preferred_element_type=jnp.float32)             # (L, S)
    scores = scores * tau + delta                        # de-stationary rescale/shift
    scores = scores * scale                              # 1/sqrt(E)

    # Numerically-stable softmax along the lane (S) axis.
    m = jnp.max(scores, axis=-1, keepdims=True)
    e = jnp.exp(scores - m)
    denom = jnp.sum(e, axis=-1, keepdims=True)
    a = e / denom                                        # (L, S) f32

    a_out_ref[0, 0] = a.astype(a_out_ref.dtype)

    v_out = jnp.dot(a.astype(v.dtype), v,
                    preferred_element_type=jnp.float32)  # (L, D)
    v_out_ref[0, 0] = v_out.astype(v_out_ref.dtype)


def ds_attention_pallas(queries, keys, values, tau=None, delta=None):
    """queries: (B, L, H, E); keys: (B, S, H, E); values: (B, S, H, D);
    tau: optional (B,)/(B,1); delta: optional (B, S)/(B,1).
    Returns (V: (B, L, H, D), A: (B, H, L, S)) — same as the PyTorch module."""
    B, L, H, E = queries.shape
    _, S, _, D = values.shape
    scale = 1.0 / math.sqrt(E)

    # Head-major layout so each kernel block is a dense (L,E)/(S,E)/(S,D) slab.
    q = jnp.transpose(queries, (0, 2, 1, 3))   # (B, H, L, E)
    k = jnp.transpose(keys, (0, 2, 1, 3))      # (B, H, S, E)
    v = jnp.transpose(values, (0, 2, 1, 3))    # (B, H, S, D)

    if tau is None:
        tau_arr = jnp.ones((B, 1, 1), jnp.float32)
    else:
        tau_arr = jnp.asarray(tau, jnp.float32).reshape(B, 1, 1)
    if delta is None:
        delta_arr = jnp.zeros((B, 1, S), jnp.float32)
    else:
        delta_arr = jnp.broadcast_to(
            jnp.asarray(delta, jnp.float32).reshape(B, 1, -1), (B, 1, S))

    kernel = partial(_ds_attention_kernel, scale=scale)

    v_out, a_out = pl.pallas_call(
        kernel,
        out_shape=(
            jax.ShapeDtypeStruct((B, H, L, D), queries.dtype),   # V (head-major)
            jax.ShapeDtypeStruct((B, H, L, S), jnp.float32),     # A
        ),
        grid_spec=pltpu.PrefetchScalarGridSpec(
            num_scalar_prefetch=0,
            grid=(B, H),
            in_specs=[
                pl.BlockSpec((1, 1, L, E), lambda b, h: (b, h, 0, 0)),
                pl.BlockSpec((1, 1, S, E), lambda b, h: (b, h, 0, 0)),
                pl.BlockSpec((1, 1, S, D), lambda b, h: (b, h, 0, 0)),
                pl.BlockSpec((1, 1, 1), lambda b, h: (b, 0, 0)),
                pl.BlockSpec((1, 1, S), lambda b, h: (b, 0, 0)),
            ],
            out_specs=[
                pl.BlockSpec((1, 1, L, D), lambda b, h: (b, h, 0, 0)),
                pl.BlockSpec((1, 1, L, S), lambda b, h: (b, h, 0, 0)),
            ],
        ),
        compiler_params=pltpu.CompilerParams(
            dimension_semantics=("parallel", "parallel")),
    )(q, k, v, tau_arr, delta_arr)

    V = jnp.transpose(v_out, (0, 2, 1, 3))     # (B, L, H, D), contiguous
    return V, a_out


def reference_jax(queries, keys, values, tau=None, delta=None):
    B, L, H, E = queries.shape
    _, S, _, D = values.shape
    scale = 1.0 / math.sqrt(E)
    t = 1.0 if tau is None else jnp.asarray(tau, jnp.float32).reshape(B, 1, 1, 1)
    d = 0.0 if delta is None else jnp.asarray(delta, jnp.float32).reshape(B, 1, 1, -1)
    scores = jnp.einsum('blhe,bshe->bhls', queries, keys) * t + d
    A = jax.nn.softmax(scale * scores, axis=-1)
    V = jnp.einsum('bhls,bshd->blhd', A, values)
    return V, A


if __name__ == "__main__":
    B, L, S, H, E, D = 2, 16, 16, 4, 32, 32

    key = jax.random.PRNGKey(0)
    kq, kk, kv, kt, kd = jax.random.split(key, 5)
    queries = jax.random.normal(kq, (B, L, H, E), jnp.float32)
    keys = jax.random.normal(kk, (B, S, H, E), jnp.float32)
    values = jax.random.normal(kv, (B, S, H, D), jnp.float32)
    tau = 0.5 + jax.random.uniform(kt, (B, 1), jnp.float32)          # positive per-batch scale
    delta = 0.1 * jax.random.normal(kd, (B, S), jnp.float32)         # per-batch shift over S

    # Path 1: tau/delta provided.
    V1, A1 = ds_attention_pallas(queries, keys, values, tau, delta)
    V1, A1 = jax.block_until_ready(V1), jax.block_until_ready(A1)
    V1_ref, A1_ref = reference_jax(queries, keys, values, tau, delta)
    assert V1.shape == (B, L, H, D) and A1.shape == (B, H, L, S)
    assert jnp.allclose(V1, V1_ref, atol=1e-4, rtol=1e-4)
    assert jnp.allclose(A1, A1_ref, atol=1e-4, rtol=1e-4)

    # Path 2: default tau=None, delta=None.
    V2, A2 = ds_attention_pallas(queries, keys, values)
    V2, A2 = jax.block_until_ready(V2), jax.block_until_ready(A2)
    V2_ref, A2_ref = reference_jax(queries, keys, values)
    assert jnp.allclose(V2, V2_ref, atol=1e-4, rtol=1e-4)
    assert jnp.allclose(A2, A2_ref, atol=1e-4, rtol=1e-4)

    print("KERNEL_OK")
</pallas_src>

<mosaic_0001>
module attributes {stable_mosaic.version = 11 : i64} {
  func.func @_ds_attention_kernel(%arg0: i32, %arg1: i32, %arg2: memref<1x1x16x32xf32, #tpu.memory_space<vmem>>, %arg3: memref<1x1x16x32xf32, #tpu.memory_space<vmem>>, %arg4: memref<1x1x16x32xf32, #tpu.memory_space<vmem>>, %arg5: memref<1x1x1xf32, #tpu.memory_space<vmem>>, %arg6: memref<1x1x16xf32, #tpu.memory_space<vmem>>, %arg7: memref<1x1x16x32xf32, #tpu.memory_space<vmem>>, %arg8: memref<1x1x16x16xf32, #tpu.memory_space<vmem>>) attributes {dimension_semantics = [#tpu.dimension_semantics<parallel>, #tpu.dimension_semantics<parallel>], iteration_bounds = array<i64: 2, 4>, scalar_prefetch = 0 : i64, scratch_operands = 0 : i64, tpu.core_type = #tpu.core_type<tc>, window_params = [{transform_indices = @transform_0, window_bounds = array<i64: 1, 1, 16, 32>}, {transform_indices = @transform_1, window_bounds = array<i64: 1, 1, 16, 32>}, {transform_indices = @transform_2, window_bounds = array<i64: 1, 1, 16, 32>}, {transform_indices = @transform_3, window_bounds = array<i64: 1, 1, 1>}, {transform_indices = @transform_4, window_bounds = array<i64: 1, 1, 16>}, {transform_indices = @transform_5, window_bounds = array<i64: 1, 1, 16, 32>}, {transform_indices = @transform_6, window_bounds = array<i64: 1, 1, 16, 16>}]} {
    %c0 = arith.constant 0 : index
    %c0_0 = arith.constant 0 : index
    %c0_1 = arith.constant 0 : index
    %c0_2 = arith.constant 0 : index
    %0 = vector.load %arg2[%c0, %c0_0, %c0_1, %c0_2] : memref<1x1x16x32xf32, #tpu.memory_space<vmem>>, vector<1x1x16x32xf32>
    %1 = vector.shape_cast %0 : vector<1x1x16x32xf32> to vector<16x32xf32>
    %c0_3 = arith.constant 0 : index
    %c0_4 = arith.constant 0 : index
    %c0_5 = arith.constant 0 : index
    %c0_6 = arith.constant 0 : index
    %2 = vector.load %arg3[%c0_3, %c0_4, %c0_5, %c0_6] : memref<1x1x16x32xf32, #tpu.memory_space<vmem>>, vector<1x1x16x32xf32>
    %3 = vector.shape_cast %2 : vector<1x1x16x32xf32> to vector<16x32xf32>
    %c0_7 = arith.constant 0 : index
    %c0_8 = arith.constant 0 : index
    %c0_9 = arith.constant 0 : index
    %c0_10 = arith.constant 0 : index
    %4 = vector.load %arg4[%c0_7, %c0_8, %c0_9, %c0_10] : memref<1x1x16x32xf32, #tpu.memory_space<vmem>>, vector<1x1x16x32xf32>
    %5 = vector.shape_cast %4 : vector<1x1x16x32xf32> to vector<16x32xf32>
    %c0_11 = arith.constant 0 : index
    %c0_12 = arith.constant 0 : index
    %c0_13 = arith.constant 0 : index
    %6 = vector.load %arg5[%c0_11, %c0_12, %c0_13] : memref<1x1x1xf32, #tpu.memory_space<vmem>>, vector<1x1x1xf32>
    %7 = vector.extract %6[0, 0, 0] : f32 from vector<1x1x1xf32>
    %c0_14 = arith.constant 0 : index
    %c0_15 = arith.constant 0 : index
    %c0_16 = arith.constant 0 : index
    %8 = vector.load %arg6[%c0_14, %c0_15, %c0_16] : memref<1x1x16xf32, #tpu.memory_space<vmem>>, vector<1x1x16xf32>
    %9 = vector.shape_cast %8 : vector<1x1x16xf32> to vector<1x16xf32>
    %cst = arith.constant dense<0.000000e+00> : vector<16x16xf32>
    %10 = tpu.matmul %1, %3, %cst {dimension_numbers = #tpu.dot_dimension_numbers<[1], [1], [0], [0], [0, 0, 1, 0], [], []>} : vector<16x32xf32>, vector<16x32xf32>, vector<16x16xf32> -> vector<16x16xf32>
    %11 = vector.broadcast %7 : f32 to vector<16x16xf32>
    %12 = arith.mulf %10, %11 : vector<16x16xf32>
    %13 = vector.broadcast %9 : vector<1x16xf32> to vector<16x16xf32>
    %14 = arith.addf %12, %13 : vector<16x16xf32>
    %cst_17 = arith.constant 0.176776692 : f32
    %15 = vector.broadcast %cst_17 : f32 to vector<16x16xf32>
    %16 = arith.mulf %14, %15 : vector<16x16xf32>
    %cst_18 = arith.constant dense<0xFF800000> : vector<16xf32>
    %17 = vector.multi_reduction <maximumf>, %16, %cst_18 [1] : vector<16x16xf32> to vector<16xf32>
    %18 = vector.shape_cast %17 : vector<16xf32> to vector<16x1xf32>
    %19 = vector.broadcast %18 : vector<16x1xf32> to vector<16x16xf32>
    %20 = arith.subf %16, %19 : vector<16x16xf32>
    %21 = math.exp %20 : vector<16x16xf32>
    %cst_19 = arith.constant dense<0.000000e+00> : vector<16xf32>
    %22 = vector.multi_reduction <add>, %21, %cst_19 [1] : vector<16x16xf32> to vector<16xf32>
    %23 = vector.shape_cast %22 : vector<16xf32> to vector<16x1xf32>
    %24 = vector.broadcast %23 : vector<16x1xf32> to vector<16x16xf32>
    %25 = arith.divf %21, %24 : vector<16x16xf32>
    %c0_20 = arith.constant 0 : index
    %c0_21 = arith.constant 0 : index
    %c0_22 = arith.constant 0 : index
    %c0_23 = arith.constant 0 : index
    %26 = vector.load %arg8[%c0_20, %c0_21, %c0_22, %c0_23] : memref<1x1x16x16xf32, #tpu.memory_space<vmem>>, vector<1x1x16x16xf32>
    %27 = vector.shape_cast %26 : vector<1x1x16x16xf32> to vector<16x16xf32>
    %28 = vector.shape_cast %25 : vector<16x16xf32> to vector<1x1x16x16xf32>
    tpu.vector_store %arg8[%c0_20, %c0_21, %c0_22, %c0_23], %28 {strides = array<i32>} : memref<1x1x16x16xf32, #tpu.memory_space<vmem>>, vector<1x1x16x16xf32>,
    %cst_24 = arith.constant dense<0.000000e+00> : vector<16x32xf32>
    %29 = tpu.matmul %25, %5, %cst_24 {dimension_numbers = #tpu.dot_dimension_numbers<[1], [0], [0], [1], [0, 0, 1, 1], [], []>} : vector<16x16xf32>, vector<16x32xf32>, vector<16x32xf32> -> vector<16x32xf32>
    %c0_25 = arith.constant 0 : index
    %c0_26 = arith.constant 0 : index
    %c0_27 = arith.constant 0 : index
    %c0_28 = arith.constant 0 : index
    %30 = vector.load %arg7[%c0_25, %c0_26, %c0_27, %c0_28] : memref<1x1x16x32xf32, #tpu.memory_space<vmem>>, vector<1x1x16x32xf32>
    %31 = vector.shape_cast %30 : vector<1x1x16x32xf32> to vector<16x32xf32>
    %32 = vector.shape_cast %29 : vector<16x32xf32> to vector<1x1x16x32xf32>
    tpu.vector_store %arg7[%c0_25, %c0_26, %c0_27, %c0_28], %32 {strides = array<i32>} : memref<1x1x16x32xf32, #tpu.memory_space<vmem>>, vector<1x1x16x32xf32>,
    return
  }
  func.func @transform_0(%arg0: i32, %arg1: i32) -> (i32, i32, i32, i32) {
    %c0_i32 = arith.constant 0 : i32
    %c0_i32_0 = arith.constant 0 : i32
    %c0_i32_1 = arith.constant 0 : i32
    return %arg0, %arg1, %c0_i32, %c0_i32_0 : i32, i32, i32, i32
  }
  func.func @transform_1(%arg0: i32, %arg1: i32) -> (i32, i32, i32, i32) {
    %c0_i32 = arith.constant 0 : i32
    %c0_i32_0 = arith.constant 0 : i32
    %c0_i32_1 = arith.constant 0 : i32
    return %arg0, %arg1, %c0_i32, %c0_i32_0 : i32, i32, i32, i32
  }
  func.func @transform_2(%arg0: i32, %arg1: i32) -> (i32, i32, i32, i32) {
    %c0_i32 = arith.constant 0 : i32
    %c0_i32_0 = arith.constant 0 : i32
    %c0_i32_1 = arith.constant 0 : i32
    return %arg0, %arg1, %c0_i32, %c0_i32_0 : i32, i32, i32, i32
  }
  func.func @transform_3(%arg0: i32, %arg1: i32) -> (i32, i32, i32) {
    %c0_i32 = arith.constant 0 : i32
    %c0_i32_0 = arith.constant 0 : i32
    %c0_i32_1 = arith.constant 0 : i32
    return %arg0, %c0_i32, %c0_i32_0 : i32, i32, i32
  }
  func.func @transform_4(%arg0: i32, %arg1: i32) -> (i32, i32, i32) {
    %c0_i32 = arith.constant 0 : i32
    %c0_i32_0 = arith.constant 0 : i32
    %c0_i32_1 = arith.constant 0 : i32
    return %arg0, %c0_i32, %c0_i32_0 : i32, i32, i32
  }
  func.func @transform_5(%arg0: i32, %arg1: i32) -> (i32, i32, i32, i32) {
    %c0_i32 = arith.constant 0 : i32
    %c0_i32_0 = arith.constant 0 : i32
    %c0_i32_1 = arith.constant 0 : i32
    return %arg0, %arg1, %c0_i32, %c0_i32_0 : i32, i32, i32, i32
  }
  func.func @transform_6(%arg0: i32, %arg1: i32) -> (i32, i32, i32, i32) {
    %c0_i32 = arith.constant 0 : i32
    %c0_i32_0 = arith.constant 0 : i32
    %c0_i32_1 = arith.constant 0 : i32
    return %arg0, %arg1, %c0_i32, %c0_i32_0 : i32, i32, i32, i32
  }
}

</mosaic_0001>

<bundles_post_ra>
// kernel: tpu_custom_call.1
= control target key start
LH: loop header
LB: loop body
LE: loop exit
PB: predicated region body
PF: predicated region fallthrough
CT: control target
= control target key end

     0   :  { %s1682_s0 = inlined_call_operand.hbm [shape: f32[2,4,16,32], index: 0, kind: input, shape index: {}]   ;;  %s1683_s1 = inlined_call_operand.hbm [shape: f32[2,4,16,32], index: 1, kind: input, shape index: {}]   ;;  %s1684_s2 = inlined_call_operand.hbm [shape: f32[2,4,16,32], index: 2, kind: input, shape index: {}]   ;;  %s1685_s3 = inlined_call_operand.vmem [shape: f32[2,1,1], index: 3, kind: input, shape index: {}]   ;;  %s1686_s4 = inlined_call_operand.vmem [shape: f32[2,1,16], index: 4, kind: input, shape index: {}]   ;;  %s1687_s5 = inlined_call_operand.hbm [shape: f32[2,4,16,32], index: 5, kind: output, shape index: {0}]   ;;  %s1688_s6 = inlined_call_operand.hbm [shape: f32[2,4,16,16], index: 6, kind: output, shape index: {1}]  }
   0x1   :  { %1702 = sst [smem:[#allocation22_spill]] %s1682_s0 }
   0x2   :  { %1703 = sst [smem:[#allocation23_spill]] %s1683_s1 }
   0x3   :  { %12 = vsyncpa [#allocation3], 0 }
   0x4   :  { %14 = vsyncpa [#allocation3 + $0x1], 0 }
   0x5   :  { %15 = vsyncpa [#allocation6], 0 }
   0x6   :  { %17 = vsyncpa [#allocation6 + $0x1], 0 }
   0x7   :  { %18 = vsyncpa [#allocation4], 0 }
   0x8   :  { %20 = vsyncpa [#allocation4 + $0x1], 0 }
   0x9   :  { %21 = vsyncpa [#allocation10], 0 }
   0xa   :  { %23 = vsyncpa [#allocation10 + $0x1], 0  ;;  %s1311_s21 = smov 0   ;;  %s1313_s22 = smov 0  }
   0xb   :  { %s1315_s23 = smov 0   ;;  %s1317_s24 = smov 0  }
   0xc   :  { %s1319_s25 = smov 0   ;;  %s1321_s26 = smov 0  }
   0xd   :  { %s1323_s27 = smov 0   ;;  %s1325_s28 = smov 0  }
   0xe LB: > { %1704 = sst [smem:[#allocation15_spill]] %s1237_s21  ;;  %s1352_s29 = sadd.s32 4294967295, %s1265_s28   ;;  %s1265_s28 = sphi %s1325_s28, %s29_s28   ;;  %s1261_s27 = sphi %s1323_s27, %s1734_s27   ;;  %s1257_s26 = sphi %s1321_s26, %s1733_s26   ;;  %s1253_s25 = sphi %s1319_s25, %s1732_s25   ;;  %s1249_s24 = sphi %s1317_s24, %s1731_s24   ;;  %s1245_s23 = sphi %s1315_s23, %s1737_s23   ;;  %s1241_s22 = sphi %s1313_s22, %s1736_s22   ;;  %s1237_s21 = sphi %s1311_s21, %s1735_s21  }
   0xf   : > { %1705 = sst [smem:[#allocation16_spill]] %s1257_s26  ;;  %s864_s30 = sadd.s32 4294967294, %s1265_s28  }
  0x10   : > { %1706 = sst [smem:[#allocation17_spill]] %s1261_s27  ;;  %s38_s7 = sadd.s32 1, %s1257_s26 }
  0x11   : > { %s41_s8 = sadd.s32 1, %s1261_s27  ;;  %p39_p0 = scmp.ge.s32.totalorder %s38_s7, 4 }
  0x12   : > { %s50_s9 = sadd.s32 1, %s1245_s23  ;;  %p57_p1 = scmp.ne.s32.totalorder %s1245_s23, %s1241_s22 }
  0x13   : > { %p58_p2 = scmp.eq.s32.totalorder %s1265_s28, 0  ;;  %s1739_s7 = smov (%p39_p0, %s38_s7), 0 }
  0x14   : > { %1707 = sst [smem:[#allocation18_spill]] %s1739_s7  ;;  %s1741_s8 = smov (!%p39_p0, %s41_s8), %s1261_s27 }
  0x15   : > { %s46_s10 = ssub.s32 %s1257_s26, %s1739_s7  ;;  %p1366_p3 = por %p58_p2, %p57_p1 }
  0x16   : > { %p43_p4 = scmp.ge.s32.totalorder %s1741_s8, 2  ;;  %p63_p5 = scmp.ne.s32.totalorder %s1241_s22, %s1237_s21 }
  0x17   : > { %p64_p6 = scmp.eq.s32.totalorder %s1352_s29, 0  ;;  %p197_p7 = scmp.eq.s32.totalorder %s1352_s29, 7 }
  0x18   : > { %s1743_s8 = smov (%p43_p4, %s1741_s8), 0  ;;  %p203_p10 = scmp.eq.s32.totalorder %s864_s30, 7 }
  0x19   : > { %1709 = sst [smem:[#allocation19_spill]] %s1743_s8  ;;  %p1376_p8 = por %p64_p6, %p63_p5 }
  0x1a   : > { %p1380_p9 = por %p197_p7, %p57_p1  ;;  %s45_s14 = ssub.s32 %s1261_s27, %s1743_s8 }
  0x1b   : > { %s1710_s12 = scalar_select %p1376_p8, 1, 0 }
  0x1c   : > { %s1711_s13 = scalar_select %p1380_p9, 1, 0 }
  0x1d   : > { %s47_s15 = sor.u32 %s46_s10, %s45_s14  ;;  %p1386_p12 = por %p203_p10, %p63_p5 }
  0x1e   : > { %p48_p11 = scmp.eq.s32.totalorder %s47_s15, 0  ;;  %p963_p13 = scmp.lt.s32.totalorder %s1265_s28, 8 }
  0x1f   : > { %s1712_s16 = scalar_select %p1386_p12, 1, 0 }
  0x20   : > { %s1691_s17 = sand.u32 1, %s1245_s23   ;;  %s868_s20 = sshll.u32 %s1257_s26, 1 }
  0x21   : > { %1713 = sst [smem:[#allocation20_spill]] %s1712_s16  ;;  %s1397_s19 = sshll.u32 %s1691_s17, 4 }
  0x22   : > { %s1393_s18 = scalar_select %p48_p11, %s1245_s23, %s50_s9  }
  0x23   : > { %s869_s7 = sshll.u32 %s1261_s27, 3  ;;  %p1403_p0 = pnand %p963_p13, %p1366_p3 }
  0x24   : > { %1714 = sst [smem:[#allocation21_spill]] %s1393_s18  ;;  %s261_s10 = sadd.s32 %s869_s7, %s868_s20 }
  0x25   : > { %s1407_s14 = sshll.u32 %s261_s10, 7  ;;  %s274_s15 = sand.u32 1, %s1265_s28  }
  0x26   : > { %s1716_s1 = sld [smem:[#allocation23_spill]]  ;;  %s278_s11 = scalar_lea.vmem [#allocation5], %s1397_s19 }
  0x27   : > { %s287_s17 = sshll.u32 %s278_s11, 4  ;;  %s1420_s27 = scalar_lea.sflag [#allocation6], %s274_s15  ;;  %s1417_s17 = int_to_ptr.vmem [resolvable:$true] %s287_s17 }
  0x28   : > { %p1426_p3 = pneg %p1403_p0 }
  0x2c   : > { %s1414_s18 = scalar_lea.hbm %s1716_s1, %s1407_s14  ;;  %s1046_s9 = scalar_lea.hbm %s1716_s1, 2048 }
  0x2d   : > { %s1041_s7 = scalar_lea.hbm %s1414_s18, 256  ;;  %p1047_p6 = scmp.lt.u32.totalorder %s1414_s18, %s1716_s1 }
  0x2e   : > { %p1042_p2 = scmp.ne.s32.totalorder %s1414_s18, %s1041_s7  ;;  %p1048_p7 = scmp.lt.u32.totalorder %s1046_s9, %s1041_s7 }
  0x2f   : > { %p1050_p11 = scmp.lt.u32.totalorder %s1041_s7, %s1414_s18 }
  0x30   : > { %p1044_p4 = pnand %p1426_p3, %p1042_p2  ;;  %p1049_p10 = por %p1048_p7, %p1047_p6 }
  0x32   : > { %p1045_p5 = pneg %p1044_p4  ;;  %p1051_p13 = por %p1050_p11, %p1049_p10 }
  0x34   : > { %p1052_p1 = pnand %p1051_p13, %p1045_p5 }
  0x36   : > { %1055 = shalt.err (!%p1052_p1)
}
  0x37   : > { %s1056_s15 = scalar_lea.vmem %s1417_s17, 256  ;;  %s1267_s8 = smov [#allocation5]  }
  0x38   : > { %p1057_p2 = scmp.ne.s32.totalorder %s1417_s17, %s1056_s15  ;;  %s1061_s10 = sshll.u32 %s1267_s8, 4  ;;  %s1062_s10 = int_to_ptr.vmem [resolvable:$false] %s1061_s10 }
  0x39   : > { %s1063_s26 = scalar_lea.vmem %s1062_s10, 512  ;;  %p1064_p9 = scmp.lt.s32.totalorder %s1417_s17, %s1062_s10 }
  0x3a   : > { %p1059_p4 = pnand %p1057_p2, %p1426_p3  ;;  %p1065_p8 = scmp.lt.s32.totalorder %s1063_s26, %s1056_s15 }
  0x3c   : > { %p1060_p12 = pneg %p1059_p4  ;;  %p1066_p6 = por %p1065_p8, %p1064_p9 }
  0x3e   : > { %p1067_p7 = pnand %p1066_p6, %p1060_p12 }
  0x40   : > { %1070 = shalt.err (!%p1067_p7)
}
  0x41   : > { %s1696_s7 = smov 128   ;;  %s1698_s9 = smov 8  }
  0x42   : > { %952 = dma.hbm_to_vmem [thread:$0]  (!%p1403_p0), %s1414_s18, 256, %s1417_s17, %s1420_s27, %s1696_s7, %s1696_s7, %s1698_s9  }
  0x43   : > { %p330_p8 = scmp.lt.s32.totalorder %s1265_s28, 9  ;;  %p1718_p9 = scmp.ge.s32.totalorder %s1265_s28, 1 }
  0x44   : > { %s1720_s0 = sld [smem:[#allocation22_spill]]  ;;  %s255_s26 = scalar_lea.vmem [#allocation2], %s1397_s19 }
  0x45   : > { %p1456_p12 = pnand %p1718_p9, %p330_p8  ;;  %s264_s1 = sshll.u32 %s255_s26, 4  ;;  %s1467_s1 = int_to_ptr.vmem [resolvable:$true] %s264_s1 }
  0x46   : > { %s1721_s17 = sand.u32 1, %s1245_s23  }
  0x47   : > { %s1719_s11 = scalar_select %p1456_p12, 1, 0 }
  0x48   : > { %s1471_s18 = scalar_lea.sflag [#allocation3], %s1721_s17 }
  0x4a   : > { %s1464_s10 = scalar_lea.hbm %s1720_s0, %s1407_s14  ;;  %s1076_s8 = scalar_lea.hbm %s1720_s0, 2048 }
  0x4b   : > { %s1071_s7 = scalar_lea.hbm %s1464_s10, 256  ;;  %p1077_p11 = scmp.lt.u32.totalorder %s1464_s10, %s1720_s0 }
  0x4c   : > { %p1072_p1 = scmp.ne.s32.totalorder %s1464_s10, %s1071_s7  ;;  %p1078_p13 = scmp.lt.u32.totalorder %s1076_s8, %s1071_s7 }
  0x4d   : > { %p1080_p4 = scmp.lt.u32.totalorder %s1071_s7, %s1464_s10 }
  0x4e   : > { %p1074_p5 = pnand %p1072_p1, %p1426_p3  ;;  %p1079_p2 = por %p1078_p13, %p1077_p11 }
  0x50   : > { %p1075_p10 = pneg %p1074_p5  ;;  %p1081_p6 = por %p1080_p4, %p1079_p2 }
  0x52   : > { %p1082_p7 = pnand %p1081_p6, %p1075_p10 }
  0x54   : > { %1085 = shalt.err (!%p1082_p7)
}
  0x55   : > { %s1086_s26 = scalar_lea.vmem %s1467_s1, 256  ;;  %s1270_s9 = smov [#allocation2]  }
  0x56   : > { %p1087_p8 = scmp.ne.s32.totalorder %s1467_s1, %s1086_s26  ;;  %s1091_s17 = sshll.u32 %s1270_s9, 4  ;;  %s1092_s17 = int_to_ptr.vmem [resolvable:$false] %s1091_s17 }
  0x57   : > { %s1093_s21 = scalar_lea.vmem %s1092_s17, 512  ;;  %p1094_p5 = scmp.lt.s32.totalorder %s1467_s1, %s1092_s17 }
  0x58   : > { %p1089_p9 = pnand %p1087_p8, %p1426_p3  ;;  %p1095_p12 = scmp.lt.s32.totalorder %s1093_s21, %s1086_s26 }
  0x5a   : > { %p1090_p1 = pneg %p1089_p9  ;;  %p1096_p11 = por %p1095_p12, %p1094_p5 }
  0x5c   : > { %p1097_p13 = pnand %p1096_p11, %p1090_p1 }
  0x5e   : > { %1100 = shalt.err (!%p1097_p13)
}
  0x5f   : > { %s1722_s16 = smov 8   ;;  %s1723_s7 = smov 128  }
  0x60   : > { %949 = dma.hbm_to_vmem [thread:$0]  (!%p1403_p0), %s1464_s10, 256, %s1467_s1, %s1471_s18, %s1723_s7, %s1723_s7, %s1722_s16  }
  0x61   : > { %s1502_s9 = scalar_lea.hbm %s1684_s2, %s1407_s14  ;;  %s301_s26 = scalar_lea.vmem [#allocation7], %s1397_s19 }
  0x62   : > { %s310_s17 = sshll.u32 %s301_s26, 4  ;;  %s1101_s21 = scalar_lea.hbm %s1502_s9, 256  ;;  %s1505_s17 = int_to_ptr.vmem [resolvable:$true] %s310_s17 }
  0x63   : > { %p1102_p12 = scmp.ne.s32.totalorder %s1502_s9, %s1101_s21  ;;  %s1106_s10 = scalar_lea.hbm %s1684_s2, 2048 }
  0x64   : > { %p1107_p4 = scmp.lt.u32.totalorder %s1502_s9, %s1684_s2  ;;  %p1108_p6 = scmp.lt.u32.totalorder %s1106_s10, %s1101_s21 }
  0x65   : > { %p1104_p10 = pnand %p1102_p12, %p1426_p3  ;;  %p1110_p8 = scmp.lt.u32.totalorder %s1101_s21, %s1502_s9 }
  0x66   : > { %p1109_p7 = por %p1108_p6, %p1107_p4 }
  0x67   : > { %p1105_p2 = pneg %p1104_p10 }
  0x68   : > { %p1111_p9 = por %p1110_p8, %p1109_p7 }
  0x6a   : > { %p1112_p1 = pnand %p1111_p9, %p1105_p2 }
  0x6c   : > { %1115 = shalt.err (!%p1112_p1)
}
  0x6d   : > { %s1116_s19 = scalar_lea.vmem %s1505_s17, 256  ;;  %s1271_s0 = smov [#allocation7]  }
  0x6e   : > { %p1117_p5 = scmp.ne.s32.totalorder %s1505_s17, %s1116_s19  ;;  %s1121_s15 = sshll.u32 %s1271_s0, 4  ;;  %s1122_s15 = int_to_ptr.vmem [resolvable:$false] %s1121_s15 }
  0x6f   : > { %s1123_s8 = scalar_lea.vmem %s1122_s15, 512  ;;  %p1124_p12 = scmp.lt.s32.totalorder %s1505_s17, %s1122_s15 }
  0x70   : > { %p1119_p11 = pnand %p1117_p5, %p1426_p3  ;;  %p1125_p10 = scmp.lt.s32.totalorder %s1123_s8, %s1116_s19 }
  0x72   : > { %p1120_p13 = pneg %p1119_p11  ;;  %p1126_p4 = por %p1125_p10, %p1124_p12 }
  0x74   : > { %p1127_p6 = pnand %p1126_p4, %p1120_p13 }
  0x76   : > { %1130 = shalt.err (!%p1127_p6)
}
  0x77   : > { %955 = dma.hbm_to_vmem [thread:$0]  (!%p1403_p0), %s1502_s9, 256, %s1505_s17, %s1420_s27, %s1723_s7, %s1723_s7, %s1722_s16  }
  0x78   : > { %p1724_p3 = scmp.ne.s32.totalorder %s1719_s11, 0 }
  0x79   : > { %s1535_s20 = sand.u32 (!%p1724_p3), 1, %s1241_s22   ;;  %p1725_p2 = scmp.ne.s32.totalorder (!%p1724_p3), %s1710_s12, 0 }
  0x7a   : > { %334 = sbr.rel (%p1724_p3) target bundleno = 908 (0x38c), region = 40  ;;  %s1538_s26 = sshll.u32 (!%p1724_p3), %s1535_s20, 4 }
  0x7b   : > { %s337_s30 = scalar_lea.sflag (!%p1724_p3), [#allocation3], %s1535_s20  ;;  %s340_s21 = scalar_lea.vmem (!%p1724_p3), [#allocation2], %s1538_s26 }
  0x81   : > { %1220 = dma.done.wait (%p1725_p2), %s337_s30, 256  }
  0x82   : > { %1222 = vsyncadd (%p1725_p2), %s337_s30, 4294967040  ;;  %s345_s27 = sand.u32 1, %s1352_s29   ;;  %s349_s16 = scalar_lea.vmem [#allocation5], %s1538_s26 }
  0x83   : > { %s346_s11 = scalar_lea.sflag [#allocation6], %s345_s27 }
  0x84   : > { %1224 = dma.done.wait (%p1725_p2), %s346_s11, 512  }
  0x85   : > { %1226 = vsyncadd (%p1725_p2), %s346_s11, 4294966784  ;;  %p408_p0 = scmp.lt.s32.totalorder %s1253_s25, 1  ;;  %vm423_vm0 = vcmask 261120   ;;  %v416_v0 = vld [vmem:[%s349_s16] sm:$0xff]  ;;  %v417_v1 = vld [vmem:[%s349_s16 + $0x8] sm:$0xff]  ;;  %vm524_vm2 = vcmask 130048  }
  0x86   : > { %vm925_vm1 = vmpackc.low %vm423_vm0, %vm423_vm0  ;;  %v414_v2 = vld [vmem:[%s340_s21] sm:$0xff]  ;;  %v924_v3 = vpack.c.bf16 %v417_v1, %v416_v0  ;;  %v415_v5 = vld [vmem:[%s340_s21 + $0x8] sm:$0xff]  ;;  %s358_s14 = scalar_lea.vmem [#allocation7], %s1538_s26  ;;  %s407_s19 = scalar_lea.vmem [#allocation9], %s1538_s26 }
  0x87   : > { %s409_s7 = scalar_select %p408_p0, %s1253_s25, 1  ;;  %914 = vmatprep.mubr.msk.f32.mxu0 %vm423_vm0, %v414_v2  ;;  %v418_v28 = vld [vmem:[%s358_s14] sm:$0xff]  ;;  %v419_v29 = vld [vmem:[%s358_s14 + $0x8] sm:$0xff] }
  0x88   : > { %926 = vmatprep.subr.msk.bf16.mxu0 %vm925_vm1, %v924_v3  ;;  %v930_v30 = vpack.c.bf16 %v419_v29, %v418_v28  ;;  %s894_s0 = sshll.u32 %s1249_s24, 1  ;;  %s895_s15 = sshll.u32 %s1253_s25, 3 }
  0x89   : > { %s410_s1 = scalar_lea.vmem %s1685_s3, %s409_s7  ;;  %929 = vmatpush3.bf16.xpose.msk.msra.mxu0 %vm925_vm1, %v924_v3  ;;  %s413_s18 = scalar_lea.vmem %s1686_s4, %s409_s7 }
  0x8a   : > { %v420_v4 = vld [vmem:[%s410_s1] sm:$0x1]  ;;  %931 = vmatprep.subr.bf16.mxu1 %v930_v30  ;;  %s1576_s8 = sadd.s32 %s895_s15, %s894_s0  ;;  %s671_s16 = sshll.u32 %s407_s19, 4  ;;  %s1586_s16 = int_to_ptr.vmem [resolvable:$true] %s671_s16 }
  0x8b   : > { %934 = vpush %v420_v4  ;;  %v889_v7 = vld [vmem:[%s413_s18] ss:$0 sm:$0xff]  ;;  %933 = vmatpush3.bf16.msra.mxu1 %v930_v30  ;;  %s896_s30 = sshll.u32 %s1576_s8, 7  ;;  %s638_s7 = scalar_lea.sflag [#allocation10], %s1535_s20 }
  0x8c   : > { %s1584_s11 = scalar_lea.hbm %s1688_s6, %s896_s30  ;;  %s1131_s24 = scalar_lea.vmem %s1586_s16, 256 }
  0x8d   : > { %p1132_p7 = scmp.ne.s32.totalorder %s1586_s16, %s1131_s24  ;;  %p1726_p8 = scmp.ne.s32.totalorder %s1711_s13, 0 }
  0x8e   : > { %s1272_s25 = smov [#allocation9]  }
  0x8f   : > { %p1133_p9 = pnand %p1132_p7, %p1726_p8  ;;  %s1135_s9 = sshll.u32 %s1272_s25, 4  ;;  %s1136_s9 = int_to_ptr.vmem [resolvable:$false] %s1135_s9 }
  0x90   : > { %915 = vmatmul.mubr.msk.f32.vlgmr.msra.gmra.mrb[0].mxu0 %vm423_vm0, %v415_v5  ;;  %s1137_s17 = scalar_lea.vmem %s1136_s9, 512  ;;  %p1138_p5 = scmp.lt.s32.totalorder %s1586_s16, %s1136_s9 }
  0x91   : > { %p1134_p1 = pneg %p1133_p9  ;;  %p1139_p11 = scmp.lt.s32.totalorder %s1137_s17, %s1131_s24 }
  0x93   : > { %p1140_p13 = por %p1139_p11, %p1138_p5 }
  0x95   : > { %p1141_p12 = pnand %p1140_p13, %p1134_p1 }
  0xbc   : > { %s935_s29 = spop %934 }
  0xbd   : > { %v511_v6 = vstv %s935_s29 }
 0x163   : > { %v916_v8 = vpop.f32.mrb[0].mxu0 }
 0x164   : > { %v513_v9 = vmul.f32 %v916_v8, %v511_v6  ;;  %v502_v10 = vpop.f32.mrb[1].mxu0 }
 0x165   : > { %v512_v11 = vmul.f32 %v511_v6, %v502_v10 }
 0x166   : > { %v521_v12 = vadd.f32 %v889_v7, %v513_v9 }
 0x167   : > { %v520_v13 = vadd.f32 %v889_v7, %v512_v11 }
 0x168   : > { %v523_v16 = vmul.f32 0.17677669, %v521_v12 }
 0x169   : > { %v522_v14 = vmul.f32 0.17677669, %v520_v13 }
 0x16a   : > { %v528_v17 = vsel %vm524_vm2, %v523_v16, -inf }
 0x16b   : > { %v525_v15 = vsel %vm524_vm2, %v522_v14, -inf }
 0x16c   : > { %526 = vmax.xlane.f32.xlu0 %v525_v15 }
 0x170   : > { %529 = vmax.xlane.f32.xlu0 %v528_v17 }
 0x1f9   : > { %v527_v18 = vpop.xlane.xlu0 %526 }
 0x1fa   : > { %v531_v19 = vsub.f32 %v522_v14, %v527_v18 }
 0x1fc   : > { %v533_v20 = vmul.f32 1.442695, %v531_v19 }
 0x1fd   : > { %v530_v21 = vpop.xlane.xlu0 %529 }
 0x1fe   : > { %1033 = vpow2.f32 %v533_v20  ;;  %v532_v22 = vsub.f32 %v523_v16, %v530_v21 }
 0x200   : > { %v535_v23 = vmul.f32 1.442695, %v532_v22 }
 0x202   : > { %1035 = vpow2.f32 %v535_v23 }
 0x208   : > { %v1034_v24 = vpop.eup %1033 }
 0x209   : > { %v537_v25 = vsel %vm524_vm2, %v1034_v24, 0.0 }
 0x20a   : > { %538 = vadd.xlane.f32.xlu1 %v537_v25 }
 0x20c   : > { %v1036_v26 = vpop.eup %1035 }
 0x20d   : > { %v540_v27 = vsel %vm524_vm2, %v1036_v26, 0.0 }
 0x20e   : > { %541 = vadd.xlane.f32.xlu1 %v540_v27 }
 0x297   : > { %v539_v31 = vpop.xlane.xlu1 %538 }
 0x298   : > { %1037 = vrcp.f32 %v539_v31 }
 0x29b   : > { %v542_v32 = vpop.xlane.xlu1 %541 }
 0x29c   : > { %1039 = vrcp.f32 %v542_v32 }
 0x2a2   : > { %v1038_v33 = vpop.eup %1037 }
 0x2a3   : > { %v544_v34 = vmul.f32 %v1038_v33, %v1034_v24 }
 0x2a5   : > { %547 = vst.msk [vmem:[%s407_s19] sm:$0xff] %vm524_vm2, %v544_v34  ;;  %921 = vmatprep.mubr.msk.f32.mxu1 %vm524_vm2, %v544_v34 }
 0x2a6   : > { %v1040_v35 = vpop.eup %1039 }
 0x2a7   : > { %v546_v36 = vmul.f32 %v1040_v35, %v1036_v26 }
 0x2a9   : > { %922 = vmatmul.mubr.msk.f32.vlgmr.msra.gmra.mrb[0].mxu1 %vm524_vm2, %v546_v36  ;;  %548 = vst.msk [vmem:[%s407_s19 + $0x8] sm:$0xff] %vm524_vm2, %v546_v36 }
 0x2aa   : > { %1144 = shalt.err (!%p1141_p12)
}
 0x2ab   : > { %s1145_s1 = scalar_lea.hbm %s1584_s11, 256  ;;  %s1149_s10 = scalar_lea.hbm %s1688_s6, 2048 }
 0x2ac   : > { %p1146_p10 = scmp.ne.s32.totalorder %s1584_s11, %s1145_s1  ;;  %p1150_p3 = scmp.lt.u32.totalorder %s1584_s11, %s1688_s6 }
 0x2ad   : > { %p1151_p2 = scmp.lt.u32.totalorder %s1149_s10, %s1145_s1  ;;  %p1153_p7 = scmp.lt.u32.totalorder %s1145_s1, %s1584_s11 }
 0x2ae   : > { %p1147_p4 = pnand %p1146_p10, %p1726_p8 }
 0x2af   : > { %p1152_p0 = por %p1151_p2, %p1150_p3 }
 0x2b0   : > { %p1148_p6 = pneg %p1147_p4 }
 0x2b1   : > { %p1154_p9 = por %p1153_p7, %p1152_p0 }
 0x2b3   : > { %p1155_p1 = pnand %p1154_p9, %p1148_p6 }
 0x2b5   : > { %1158 = shalt.err (!%p1155_p1)
}
 0x2b6   : > { %s1273_s19 = smov 128   ;;  %s1274_s0 = smov 8  }
 0x2b7   : > { %943 = dma.vmem_to_hbm [thread:$0]  (%p1726_p8), %s1586_s16, 256, %s1584_s11, %s638_s7, %s1273_s19, %s1273_s19, %s1274_s0  }
 0x2b8   : > { %s400_s15 = scalar_lea.vmem [#allocation8], %s1538_s26  ;;  %s1623_s25 = scalar_lea.hbm %s1687_s5, %s896_s30 }
 0x2b9   : > { %s653_s21 = sshll.u32 %s400_s15, 4  ;;  %s633_s11 = scalar_lea.sflag [#allocation4], %s1535_s20  ;;  %s1616_s21 = int_to_ptr.vmem [resolvable:$true] %s653_s21 }
 0x2ba   : > { %s1159_s26 = scalar_lea.vmem %s1616_s21, 256  ;;  %s1275_s16 = smov [#allocation8]  }
 0x2bb   : > { %p1160_p5 = scmp.ne.s32.totalorder %s1616_s21, %s1159_s26  ;;  %s1163_s7 = sshll.u32 %s1275_s16, 4  ;;  %s1164_s7 = int_to_ptr.vmem [resolvable:$false] %s1163_s7 }
 0x2bc   : > { %s1165_s8 = scalar_lea.vmem %s1164_s7, 512  ;;  %p1166_p12 = scmp.lt.s32.totalorder %s1616_s21, %s1164_s7 }
 0x2bd   : > { %p1161_p11 = pnand %p1160_p5, %p1726_p8  ;;  %p1167_p10 = scmp.lt.s32.totalorder %s1165_s8, %s1159_s26 }
 0x2bf   : > { %p1162_p13 = pneg %p1161_p11  ;;  %p1168_p4 = por %p1167_p10, %p1166_p12 }
 0x2c1   : > { %p1169_p6 = pnand %p1168_p4, %p1162_p13 }
 0x37c   : > { %v923_v37 = vpop.f32.mrb[0].mxu1 }
 0x37d   : > { %631 = vst.msk [vmem:[%s400_s15 + $0x8] sm:$0xff] %vm423_vm0, %v923_v37  ;;  %v621_v38 = vpop.f32.mrb[1].mxu1 }
 0x37e   : > { %630 = vst.msk [vmem:[%s400_s15] sm:$0xff] %vm423_vm0, %v621_v38 }
 0x37f   : > { %1172 = shalt.err (!%p1169_p6)
}
 0x380   : > { %s1173_s30 = scalar_lea.hbm %s1623_s25, 256  ;;  %s1177_s1 = scalar_lea.hbm %s1687_s5, 2048 }
 0x381   : > { %p1174_p3 = scmp.ne.s32.totalorder %s1623_s25, %s1173_s30  ;;  %p1178_p7 = scmp.lt.u32.totalorder %s1623_s25, %s1687_s5 }
 0x382   : > { %p1179_p9 = scmp.lt.u32.totalorder %s1177_s1, %s1173_s30  ;;  %p1181_p5 = scmp.lt.u32.totalorder %s1173_s30, %s1623_s25 }
 0x383   : > { %p1175_p2 = pnand %p1174_p3, %p1726_p8 }
 0x384   : > { %p1180_p1 = por %p1179_p9, %p1178_p7 }
 0x385   : > { %p1176_p0 = pneg %p1175_p2 }
 0x386   : > { %p1182_p11 = por %p1181_p5, %p1180_p1 }
 0x388   : > { %p1183_p13 = pnand %p1182_p11, %p1176_p0 }
 0x38a   : > { %1186 = shalt.err (!%p1183_p13)
}
 0x38b   : > { %942 = dma.vmem_to_hbm [thread:$0]  (%p1726_p8), %s1616_s21, 256, %s1623_s25, %s633_s11, %s1273_s19, %s1273_s19, %s1274_s0  }
 0x38c PF: > { %s1727_s10 = sld [smem:[#allocation15_spill]]  ;;  %s1728_s18 = sld [smem:[#allocation20_spill]] }
 0x38d   : > { %p964_p12 = scmp.ge.s32.totalorder %s1265_s28, 2 }
 0x392   : > { %s686_s14 = sand.u32 1, %s1727_s10   ;;  %p1729_p10 = scmp.ne.s32.totalorder %s1728_s18, 0 }
 0x393   : > { %s687_s15 = scalar_lea.sflag [#allocation4], %s686_s14 }
 0x394   : > { %p957_p4 = pnand %p964_p12, %p1729_p10 }
 0x396   : > { %1228 = dma.done.wait (!%p957_p4), %s687_s15, 256  }
 0x397   : > { %1230 = vsyncadd (!%p957_p4), %s687_s15, 4294967040  ;;  %s696_s13 = scalar_lea.sflag [#allocation10], %s686_s14 }
 0x398   : > { %1232 = dma.done.wait (!%p957_p4), %s696_s13, 256  }
 0x399   : > { %1234 = vsyncadd (!%p957_p4), %s696_s13, 4294967040  ;;  %s29_s28 = sadd.s32 1, %s1265_s28   ;;  %s1730_s20 = sld [smem:[#allocation21_spill]] }
 0x39a   : > { %p26_p6 = scmp.ge.s32.totalorder %s29_s28, 10   ;;  %s1731_s24 = sld [smem:[#allocation16_spill]] }
 0x39b   : > { %s1732_s25 = sld [smem:[#allocation17_spill]]  ;;  %s1733_s26 = sld [smem:[#allocation18_spill]] }
 0x39c   : > { %s1734_s27 = sld [smem:[#allocation19_spill]]  ;;  %s1735_s21 = smov %s1241_s22 }
 0x39d   : > { %s1736_s22 = smov %s1245_s23  ;;  %28 = sbr.rel (!%p26_p6) target bundleno = 14 (0xe), region = 132 }
 0x39f   : > { %s1737_s23 = smov %s1730_s20 }
 0x3a4   :  { %701 = vsyncpa [#allocation3], 1 }
 0x3a5   :  { %703 = vsyncpa [#allocation3 + $0x1], 1 }
 0x3a6   :  { %704 = vsyncpa [#allocation6], 1 }
 0x3a7   :  { %706 = vsyncpa [#allocation6 + $0x1], 1 }
 0x3a8   :  { %707 = vsyncpa [#allocation4], 1 }
 0x3a9   :  { %709 = vsyncpa [#allocation4 + $0x1], 1 }
 0x3aa   :  { %710 = vsyncpa [#allocation10], 1 }
 0x3ab   :  { %712 = vsyncpa [#allocation10 + $0x1], 1 }

</bundles_post_ra>
